<compile_context>
chip_gen: v5e
topology: v5e:2x2
jax: 0.10.0
libtpu: 0.0.40
codegen_flags: <defaults>
</compile_context>

<pallas_src>
import numpy as np
import jax
import jax.numpy as jnp
from jax.experimental import pallas as pl
from jax.experimental.pallas import tpu as pltpu


# ----------------------------------------------------------------------------
# Pallas kernel (single grid step computes the whole module forward)
# ----------------------------------------------------------------------------
def rope_mha_kernel(x_ref, w_ref, tab_ref, out_ref):
    BM, D = x_ref.shape                    # (B*M, D)
    rows, HD = tab_ref.shape               # (2*M + 1, H*D)
    M = (rows - 1) // 2
    H = HD // D
    B = BM // M

    # One lane-dense matmul -> q*scale, (q@P)*scale, k, k@P, v_eff for all heads.
    proj = jnp.dot(x_ref[...], w_ref[...],
                   preferred_element_type=jnp.float32)           # (B*M, 5*H*D)

    # RoPE tables (per position, tiled over heads); tile over batch in-kernel.
    cos = jnp.concatenate([tab_ref[0:M, :]] * B, axis=0)         # (B*M, H*D)
    sin = jnp.concatenate([tab_ref[M:2 * M, :]] * B, axis=0)     # (B*M, H*D)

    # Exact rotary rotation: q @ R[pos] == q*cos + swap_pairs(q)*sin.
    # (1/sqrt(D) is already folded into the q-side weights.)
    q_rot = proj[:, 0 * HD:1 * HD] * cos + proj[:, 1 * HD:2 * HD] * sin
    k_rot = proj[:, 2 * HD:3 * HD] * cos + proj[:, 3 * HD:4 * HD] * sin
    v_eff = proj[:, 4 * HD:5 * HD]         # already mapped through output Linear

    # (B*M, H*D) -> (H*B, M, D): head-major batch for one pair of batched einsums.
    def to_heads(t2d):
        return jnp.stack([t2d[:, h * D:(h + 1) * D] for h in range(H)],
                         axis=0).reshape(H * B, M, D)

    qh = to_heads(q_rot)                   # (H*B, M, D)
    kh = to_heads(k_rot)
    vh = to_heads(v_eff)

    s = jnp.einsum('bqd,bkd->bqk', qh, kh,
                   preferred_element_type=jnp.float32)           # (H*B, M, M)
    s = s - jnp.max(s, axis=-1, keepdims=True)
    e = jnp.exp(s)
    p = e * pl.reciprocal(jnp.sum(e, axis=-1, keepdims=True), approx=True)
    o = jnp.einsum('bqk,bkd->bqd', p, vh,
                   preferred_element_type=jnp.float32)           # (H*B, M, D)

    # Head-sum (output projection already folded into v_eff) + output bias.
    bias = tab_ref[2 * M:2 * M + 1, 0:D]                         # (1, D)
    out_ref[...] = o.reshape(H, B * M, D).sum(axis=0) + bias     # (B*M, D)


# ----------------------------------------------------------------------------
# Wrapper
# ----------------------------------------------------------------------------
def rope_multihead_attention(x, w_big, tables):
    """x: (B, M, D) f32.  w_big: (D, 5*H*D).  tables: (2*M+1, H*D)."""
    B, M, D = x.shape
    x2d = x.reshape(B * M, D)              # free metadata reshape in the wrapper

    out2d = pl.pallas_call(
        rope_mha_kernel,
        out_shape=jax.ShapeDtypeStruct((B * M, D), jnp.float32),
        grid=(1,),
        in_specs=[
            pl.BlockSpec((B * M, D), lambda i: (0, 0)),          # x (2-D lane-dense)
            pl.BlockSpec(tuple(w_big.shape), lambda i: (0, 0)),  # stacked proj weights
            pl.BlockSpec(tuple(tables.shape), lambda i: (0, 0)), # cos|sin|bias table
        ],
        out_specs=pl.BlockSpec((B * M, D), lambda i: (0, 0)),
        compiler_params=pltpu.CompilerParams(
            dimension_semantics=("arbitrary",)),
    )(x2d, w_big, tables)

    return out2d.reshape(B, M, D)


# ----------------------------------------------------------------------------
# Host-side parameter / RoPE-table construction (plain numpy glue)
# ----------------------------------------------------------------------------
def build_rotary_matrix(seq_len, dim):
    """Exactly the PyTorch get_rotary_matrix (including the (i-1) exponent)."""
    R = np.zeros((seq_len, dim, dim), np.float32)
    for pos in range(seq_len):
        for i in range(dim // 2):
            theta = 10000.0 ** (-2.0 * (i - 1) / dim)
            mt = pos * theta
            R[pos, 2 * i, 2 * i] = np.cos(mt)
            R[pos, 2 * i, 2 * i + 1] = -np.sin(mt)
            R[pos, 2 * i + 1, 2 * i] = np.sin(mt)
            R[pos, 2 * i + 1, 2 * i + 1] = np.cos(mt)
    return R


def build_rope_tables(seq_len, dim):
    i = np.arange(dim // 2, dtype=np.float64)
    theta = 10000.0 ** (-2.0 * (i - 1) / dim)              # PyTorch (i-1) quirk kept
    ang = np.arange(seq_len)[:, None] * theta[None, :]     # (M, D/2)
    cosM = np.repeat(np.cos(ang), 2, axis=1).astype(np.float32)        # (M, D)
    sinM = np.zeros((seq_len, dim), np.float32)
    sinM[:, 0::2] = np.sin(ang)
    sinM[:, 1::2] = -np.sin(ang)
    P = np.zeros((dim, dim), np.float32)                   # even/odd pair-swap
    for j in range(dim // 2):
        P[2 * j + 1, 2 * j] = 1.0
        P[2 * j, 2 * j + 1] = 1.0
    return cosM, sinM, P


def pack_params(Wq, Wk, Wv, Wl, bl, cosM, sinM, P):
    """Fold permutation, 1/sqrt(D) scale and the output Linear into the weights;
    stack all heads lane-dense; pack cos/sin/bias into one table."""
    Wq = np.asarray(Wq); Wk = np.asarray(Wk); Wv = np.asarray(Wv)
    Wl = np.asarray(Wl); bl = np.asarray(bl)
    H, D, _ = Wq.shape
    scale = np.float32(1.0 / np.sqrt(np.float32(D)))

    # Transposed so y = x @ W (PyTorch Linear weight is (out, in)).
    WqT = np.transpose(Wq, (0, 2, 1))
    WkT = np.transpose(Wk, (0, 2, 1))
    WvT = np.transpose(Wv, (0, 2, 1))
    WoT = Wl.T                                              # (H*D, D)

    # Output projection folded into per-head V weights.
    Wv_eff = [WvT[h] @ WoT[h * D:(h + 1) * D, :] for h in range(H)]  # H x (D, D)

    def hcat(mats):                                         # list of (D, D) -> (D, H*D)
        return np.concatenate(mats, axis=1)

    w_big = np.concatenate(
        [hcat([WqT[h] for h in range(H)]) * scale,          # q * scale
         hcat([WqT[h] @ P for h in range(H)]) * scale,      # (q @ P) * scale
         hcat([WkT[h] for h in range(H)]),                  # k
         hcat([WkT[h] @ P for h in range(H)]),              # k @ P
         hcat(Wv_eff)],                                     # v folded through Wo
        axis=1).astype(np.float32)                          # (D, 5*H*D)

    # Single table: rows [0, M) cos, rows [M, 2M) sin, row 2M = output bias.
    cos_t = np.tile(cosM, (1, H)).astype(np.float32)        # (M, H*D)
    sin_t = np.tile(sinM, (1, H)).astype(np.float32)        # (M, H*D)
    bias_row = np.zeros((1, H * D), np.float32)
    bias_row[0, :D] = bl
    tables = np.concatenate([cos_t, sin_t, bias_row], axis=0)  # (2*M+1, H*D)

    return jnp.asarray(w_big), jnp.asarray(tables)


def reference_forward(x, Wq, Wk, Wv, R, Wl, bl):
    """Pure-JAX reference mirroring the PyTorch forward (dropout off)."""
    B, M, D = x.shape
    H = Wq.shape[0]
    heads = []
    for h in range(H):
        q = x @ Wq[h].T
        k = x @ Wk[h].T
        v = x @ Wv[h].T
        q_rot = jnp.einsum('bmd,mde->bme', q, R[:M])
        k_rot = jnp.einsum('bmd,mde->bme', k, R[:M])
        s = jnp.einsum('bqd,bkd->bqk', q_rot, k_rot) / jnp.sqrt(jnp.float32(D))
        p = jax.nn.softmax(s, axis=-1)
        heads.append(jnp.einsum('bqk,bkd->bqd', p, v))
    cat = jnp.concatenate(heads, axis=-1)
    return cat @ Wl.T + bl


# ----------------------------------------------------------------------------
# Main
# ----------------------------------------------------------------------------
if __name__ == "__main__":
    B, M, D, H = 2, 8, 32, 4     # batch, seq_len, dim, heads

    key = jax.random.PRNGKey(0)
    k0, k1, k2, k3, k4, k5 = jax.random.split(key, 6)

    # PyTorch-style parameter shapes (Linear weight is (out_features, in_features))
    Wq = jax.random.normal(k0, (H, D, D), jnp.float32) * 0.1
    Wk = jax.random.normal(k1, (H, D, D), jnp.float32) * 0.1
    Wv = jax.random.normal(k2, (H, D, D), jnp.float32) * 0.1
    Wl = jax.random.normal(k3, (D, H * D), jnp.float32) * 0.1   # output Linear weight
    bl = jax.random.normal(k4, (D,), jnp.float32) * 0.1         # output Linear bias
    x = jax.random.normal(k5, (B, M, D), jnp.float32)

    # RoPE tables and packed kernel-layout parameters
    R = jnp.asarray(build_rotary_matrix(M, D))
    cosM, sinM, P = build_rope_tables(M, D)
    w_big, tables = pack_params(Wq, Wk, Wv, Wl, bl, cosM, sinM, P)

    out = rope_multihead_attention(x, w_big, tables)
    out = jax.block_until_ready(out)

    ref = jax.block_until_ready(reference_forward(x, Wq, Wk, Wv, R, Wl, bl))
    np.testing.assert_allclose(np.asarray(out), np.asarray(ref),
                               rtol=5e-3, atol=5e-3)

    print("KERNEL_OK")
</pallas_src>

<mosaic_0001>
module attributes {stable_mosaic.version = 11 : i64} {
  func.func @rope_mha_kernel(%arg0: i32, %arg1: memref<16x32xf32, #tpu.memory_space<vmem>>, %arg2: memref<32x640xf32, #tpu.memory_space<vmem>>, %arg3: memref<17x128xf32, #tpu.memory_space<vmem>>, %arg4: memref<16x32xf32, #tpu.memory_space<vmem>>) attributes {dimension_semantics = [#tpu.dimension_semantics<arbitrary>], iteration_bounds = array<i64: 1>, scalar_prefetch = 0 : i64, scratch_operands = 0 : i64, tpu.core_type = #tpu.core_type<tc>, window_params = [{pipeline_mode = #tpu.pipeline_mode<synchronous>, transform_indices = @transform_0, window_bounds = array<i64: 16, 32>}, {pipeline_mode = #tpu.pipeline_mode<synchronous>, transform_indices = @transform_1, window_bounds = array<i64: 32, 640>}, {pipeline_mode = #tpu.pipeline_mode<synchronous>, transform_indices = @transform_2, window_bounds = array<i64: 17, 128>}, {pipeline_mode = #tpu.pipeline_mode<synchronous>, transform_indices = @transform_3, window_bounds = array<i64: 16, 32>}]} {
    %c0 = arith.constant 0 : index
    %c0_0 = arith.constant 0 : index
    %0 = vector.load %arg1[%c0, %c0_0] : memref<16x32xf32, #tpu.memory_space<vmem>>, vector<16x32xf32>
    %c0_1 = arith.constant 0 : index
    %c0_2 = arith.constant 0 : index
    %1 = vector.load %arg2[%c0_1, %c0_2] : memref<32x640xf32, #tpu.memory_space<vmem>>, vector<32x640xf32>
    %cst = arith.constant dense<0.000000e+00> : vector<16x640xf32>
    %2 = tpu.matmul %0, %1, %cst {dimension_numbers = #tpu.dot_dimension_numbers<[1], [0], [0], [1], [0, 0, 1, 1], [], []>} : vector<16x32xf32>, vector<32x640xf32>, vector<16x640xf32> -> vector<16x640xf32>
    %c0_3 = arith.constant 0 : index
    %c0_4 = arith.constant 0 : index
    %3 = vector.load %arg3[%c0_3, %c0_4] : memref<17x128xf32, #tpu.memory_space<vmem>>, vector<8x128xf32>
    %4 = tpu.concatenate %3, %3 in 0 : vector<8x128xf32>, vector<8x128xf32> -> vector<16x128xf32>
    %c8 = arith.constant 8 : index
    %c0_5 = arith.constant 0 : index
    %5 = vector.load %arg3[%c8, %c0_5] : memref<17x128xf32, #tpu.memory_space<vmem>>, vector<8x128xf32>
    %6 = tpu.concatenate %5, %5 in 0 : vector<8x128xf32>, vector<8x128xf32> -> vector<16x128xf32>
    %7 = vector.extract_strided_slice %2 {offsets = [0, 0], sizes = [16, 128], strides = [1, 1]} : vector<16x640xf32> to vector<16x128xf32>
    %8 = arith.mulf %7, %4 : vector<16x128xf32>
    %9 = vector.extract_strided_slice %2 {offsets = [0, 128], sizes = [16, 128], strides = [1, 1]} : vector<16x640xf32> to vector<16x128xf32>
    %10 = arith.mulf %9, %6 : vector<16x128xf32>
    %11 = arith.addf %8, %10 : vector<16x128xf32>
    %12 = vector.extract_strided_slice %2 {offsets = [0, 256], sizes = [16, 128], strides = [1, 1]} : vector<16x640xf32> to vector<16x128xf32>
    %13 = arith.mulf %12, %4 : vector<16x128xf32>
    %14 = vector.extract_strided_slice %2 {offsets = [0, 384], sizes = [16, 128], strides = [1, 1]} : vector<16x640xf32> to vector<16x128xf32>
    %15 = arith.mulf %14, %6 : vector<16x128xf32>
    %16 = arith.addf %13, %15 : vector<16x128xf32>
    %17 = vector.extract_strided_slice %2 {offsets = [0, 512], sizes = [16, 128], strides = [1, 1]} : vector<16x640xf32> to vector<16x128xf32>
    %18 = vector.extract_strided_slice %11 {offsets = [0, 0], sizes = [16, 32], strides = [1, 1]} : vector<16x128xf32> to vector<16x32xf32>
    %19 = vector.extract_strided_slice %11 {offsets = [0, 32], sizes = [16, 32], strides = [1, 1]} : vector<16x128xf32> to vector<16x32xf32>
    %20 = vector.extract_strided_slice %11 {offsets = [0, 64], sizes = [16, 32], strides = [1, 1]} : vector<16x128xf32> to vector<16x32xf32>
    %21 = vector.extract_strided_slice %11 {offsets = [0, 96], sizes = [16, 32], strides = [1, 1]} : vector<16x128xf32> to vector<16x32xf32>
    %22 = vector.shape_cast %18 : vector<16x32xf32> to vector<1x16x32xf32>
    %23 = vector.shape_cast %19 : vector<16x32xf32> to vector<1x16x32xf32>
    %24 = vector.shape_cast %20 : vector<16x32xf32> to vector<1x16x32xf32>
    %25 = vector.shape_cast %21 : vector<16x32xf32> to vector<1x16x32xf32>
    %26 = tpu.concatenate %22, %23, %24, %25 in 0 : vector<1x16x32xf32>, vector<1x16x32xf32>, vector<1x16x32xf32>, vector<1x16x32xf32> -> vector<4x16x32xf32>
    %27 = vector.shape_cast %26 : vector<4x16x32xf32> to vector<8x8x32xf32>
    %28 = vector.extract_strided_slice %16 {offsets = [0, 0], sizes = [16, 32], strides = [1, 1]} : vector<16x128xf32> to vector<16x32xf32>
    %29 = vector.extract_strided_slice %16 {offsets = [0, 32], sizes = [16, 32], strides = [1, 1]} : vector<16x128xf32> to vector<16x32xf32>
    %30 = vector.extract_strided_slice %16 {offsets = [0, 64], sizes = [16, 32], strides = [1, 1]} : vector<16x128xf32> to vector<16x32xf32>
    %31 = vector.extract_strided_slice %16 {offsets = [0, 96], sizes = [16, 32], strides = [1, 1]} : vector<16x128xf32> to vector<16x32xf32>
    %32 = vector.shape_cast %28 : vector<16x32xf32> to vector<1x16x32xf32>
    %33 = vector.shape_cast %29 : vector<16x32xf32> to vector<1x16x32xf32>
    %34 = vector.shape_cast %30 : vector<16x32xf32> to vector<1x16x32xf32>
    %35 = vector.shape_cast %31 : vector<16x32xf32> to vector<1x16x32xf32>
    %36 = tpu.concatenate %32, %33, %34, %35 in 0 : vector<1x16x32xf32>, vector<1x16x32xf32>, vector<1x16x32xf32>, vector<1x16x32xf32> -> vector<4x16x32xf32>
    %37 = vector.shape_cast %36 : vector<4x16x32xf32> to vector<8x8x32xf32>
    %38 = vector.extract_strided_slice %17 {offsets = [0, 0], sizes = [16, 32], strides = [1, 1]} : vector<16x128xf32> to vector<16x32xf32>
    %39 = vector.extract_strided_slice %17 {offsets = [0, 32], sizes = [16, 32], strides = [1, 1]} : vector<16x128xf32> to vector<16x32xf32>
    %40 = vector.extract_strided_slice %17 {offsets = [0, 64], sizes = [16, 32], strides = [1, 1]} : vector<16x128xf32> to vector<16x32xf32>
    %41 = vector.extract_strided_slice %17 {offsets = [0, 96], sizes = [16, 32], strides = [1, 1]} : vector<16x128xf32> to vector<16x32xf32>
    %42 = vector.shape_cast %38 : vector<16x32xf32> to vector<1x16x32xf32>
    %43 = vector.shape_cast %39 : vector<16x32xf32> to vector<1x16x32xf32>
    %44 = vector.shape_cast %40 : vector<16x32xf32> to vector<1x16x32xf32>
    %45 = vector.shape_cast %41 : vector<16x32xf32> to vector<1x16x32xf32>
    %46 = tpu.concatenate %42, %43, %44, %45 in 0 : vector<1x16x32xf32>, vector<1x16x32xf32>, vector<1x16x32xf32>, vector<1x16x32xf32> -> vector<4x16x32xf32>
    %47 = vector.shape_cast %46 : vector<4x16x32xf32> to vector<8x8x32xf32>
    "tpu.trace_start"() <{level = 10 : i32, message = "bqd,bkd->bqk"}> : () -> ()
    %cst_6 = arith.constant dense<0.000000e+00> : vector<8x8x8xf32>
    %48 = tpu.matmul %27, %37, %cst_6 {dimension_numbers = #tpu.dot_dimension_numbers<[2], [2], [1], [1], [0, 0, 0, 1, 1, 1], [0], [0]>} : vector<8x8x32xf32>, vector<8x8x32xf32>, vector<8x8x8xf32> -> vector<8x8x8xf32>
    "tpu.trace_stop"() : () -> ()
    %cst_7 = arith.constant dense<0xFF800000> : vector<8x8xf32>
    %49 = vector.multi_reduction <maximumf>, %48, %cst_7 [2] : vector<8x8x8xf32> to vector<8x8xf32>
    %50 = vector.shape_cast %49 : vector<8x8xf32> to vector<8x8x1xf32>
    %51 = vector.broadcast %50 : vector<8x8x1xf32> to vector<8x8x8xf32>
    %52 = arith.subf %48, %51 : vector<8x8x8xf32>
    %53 = math.exp %52 : vector<8x8x8xf32>
    %cst_8 = arith.constant dense<0.000000e+00> : vector<8x8xf32>
    %54 = vector.multi_reduction <add>, %53, %cst_8 [2] : vector<8x8x8xf32> to vector<8x8xf32>
    %55 = vector.shape_cast %54 : vector<8x8xf32> to vector<8x8x1xf32>
    %56 = tpu.reciprocal %55 {approx = true} : vector<8x8x1xf32> -> vector<8x8x1xf32>
    %57 = vector.broadcast %56 : vector<8x8x1xf32> to vector<8x8x8xf32>
    %58 = arith.mulf %53, %57 : vector<8x8x8xf32>
    "tpu.trace_start"() <{level = 10 : i32, message = "bqk,bkd->bqd"}> : () -> ()
    %cst_9 = arith.constant dense<0.000000e+00> : vector<8x8x32xf32>
    %59 = tpu.matmul %58, %47, %cst_9 {dimension_numbers = #tpu.dot_dimension_numbers<[2], [1], [1], [2], [0, 0, 0, 1, 1, 2], [0], [0]>} : vector<8x8x8xf32>, vector<8x8x32xf32>, vector<8x8x32xf32> -> vector<8x8x32xf32>
    "tpu.trace_stop"() : () -> ()
    %c16 = arith.constant 16 : index
    %c0_10 = arith.constant 0 : index
    %60 = vector.load %arg3[%c16, %c0_10] : memref<17x128xf32, #tpu.memory_space<vmem>>, vector<1x32xf32>
    %61 = vector.shape_cast %59 : vector<8x8x32xf32> to vector<4x16x32xf32>
    %cst_11 = arith.constant dense<0.000000e+00> : vector<16x32xf32>
    %62 = vector.multi_reduction <add>, %61, %cst_11 [0] : vector<4x16x32xf32> to vector<16x32xf32>
    %63 = vector.broadcast %60 : vector<1x32xf32> to vector<16x32xf32>
    %64 = arith.addf %62, %63 : vector<16x32xf32>
    %c0_12 = arith.constant 0 : index
    %c0_13 = arith.constant 0 : index
    %65 = vector.load %arg4[%c0_12, %c0_13] : memref<16x32xf32, #tpu.memory_space<vmem>>, vector<16x32xf32>
    tpu.vector_store %arg4[%c0_12, %c0_13], %64 {strides = array<i32>} : memref<16x32xf32, #tpu.memory_space<vmem>>, vector<16x32xf32>,
    return
  }
  func.func @transform_0(%arg0: i32) -> (i32, i32) {
    %c0_i32 = arith.constant 0 : i32
    %c0_i32_0 = arith.constant 0 : i32
    %c0_i32_1 = arith.constant 0 : i32
    return %c0_i32, %c0_i32_0 : i32, i32
  }
  func.func @transform_1(%arg0: i32) -> (i32, i32) {
    %c0_i32 = arith.constant 0 : i32
    %c0_i32_0 = arith.constant 0 : i32
    %c0_i32_1 = arith.constant 0 : i32
    return %c0_i32, %c0_i32_0 : i32, i32
  }
  func.func @transform_2(%arg0: i32) -> (i32, i32) {
    %c0_i32 = arith.constant 0 : i32
    %c0_i32_0 = arith.constant 0 : i32
    %c0_i32_1 = arith.constant 0 : i32
    return %c0_i32, %c0_i32_0 : i32, i32
  }
  func.func @transform_3(%arg0: i32) -> (i32, i32) {
    %c0_i32 = arith.constant 0 : i32
    %c0_i32_0 = arith.constant 0 : i32
    %c0_i32_1 = arith.constant 0 : i32
    return %c0_i32, %c0_i32_0 : i32, i32
  }
}

</mosaic_0001>

<bundles_post_ra>
// kernel: tpu_custom_call.1
= control target key start
LH: loop header
LB: loop body
LE: loop exit
PB: predicated region body
PF: predicated region fallthrough
CT: control target
= control target key end

     0   :  { %8 = vsyncpa [#allocation3], 0  ;;  %s1115_s0 = inlined_call_operand.hbm [shape: f32[16,32], index: 0, kind: input, shape index: {}]   ;;  %s1116_s1 = inlined_call_operand.hbm [shape: f32[32,640], index: 1, kind: input, shape index: {}]   ;;  %s1117_s2 = inlined_call_operand.hbm [shape: f32[17,128], index: 2, kind: input, shape index: {}]   ;;  %s1118_s3 = inlined_call_operand.hbm [shape: f32[16,32], index: 3, kind: output, shape index: {}]  }
   0x1   :  { %9 = vsyncpa [#allocation6], 0  ;;  %s28_s14 = sshll.u32 %s1116_s1, 4  ;;  %s29_s14 = int_to_ptr.hbm [resolvable:$true] %s28_s14 }
   0x2   :  { %10 = vsyncpa [#allocation4], 0  ;;  %s968_s15 = smov [#allocation5]   ;;  %s15_s19 = sshll.u32 %s1115_s0, 4  ;;  %s16_s19 = int_to_ptr.hbm [resolvable:$true] %s15_s19 }
   0x3   :  { %s30_s16 = sshll.u32 %s968_s15, 4  ;;  %s969_s20 = smov 640   ;;  %s31_s16 = int_to_ptr.vmem [resolvable:$true] %s30_s16 }
   0x4   :  { %s970_s21 = smov 40   ;;  %s971_s22 = smov [#allocation2]  }
   0x5   :  { %36 = dma.hbm_to_vmem [thread:$0]  %s29_s14, 2560, %s31_s16, [#allocation6], %s969_s20, %s969_s20, %s970_s21  }
   0x6   :  { %s17_s23 = sshll.u32 %s971_s22, 4  ;;  %s972_s24 = smov 128   ;;  %s18_s23 = int_to_ptr.vmem [resolvable:$true] %s17_s23 }
   0x7   :  { %s973_s25 = smov 8   ;;  %s41_s27 = sshll.u32 %s1117_s2, 4  ;;  %s42_s27 = int_to_ptr.hbm [resolvable:$true] %s41_s27 }
   0x8   :  { %23 = dma.hbm_to_vmem [thread:$0]  %s16_s19, 256, %s18_s23, [#allocation3], %s972_s24, %s972_s24, %s973_s25  }
   0x9   :  { %s974_s28 = smov [#allocation7]  }
   0xa   :  { %s43_s0 = sshll.u32 %s974_s28, 4  ;;  %s44_s0 = int_to_ptr.vmem [resolvable:$true] %s43_s0 }
   0xb   :  { %49 = dma.hbm_to_vmem [thread:$0]  %s42_s27, 384, %s44_s0, [#allocation6], %s972_s24, %s972_s24, %s973_s25  }
   0xc   :  { %962 = dma.done.wait [#allocation3], 256  }
   0xd   :  { %963 = vsyncadd [#allocation3], 4294967040 }
   0xe   :  { %964 = dma.done.wait [#allocation6], 2944  }
   0xf   :  { %965 = vsyncadd [#allocation6], 4294964352  ;;  %v79_v0 = vld [vmem:[#allocation5 + $0x78] sm:$0xff]  ;;  %v80_v1 = vld [vmem:[#allocation5 + $0x80] sm:$0xff]  ;;  %vm84_vm0 = vcmask 261120   ;;  %s975_s2 = smov 64  }
  0x10   :  { %v81_v2 = vld [vmem:[#allocation5 + $0x88] sm:$0xff]  ;;  %103 = vmatpush.msra.mxu0 %v79_v0  ;;  %126 = vmatpush.msra.mxu1 %v80_v1  ;;  %v82_v3 = vld [vmem:[#allocation5 + $0x90] sm:$0xff]  ;;  %v75_v5 = vld [vmem:[#allocation5 + $0x58] sm:$0xff]  ;;  %s976_s29 = smov 96   ;;  %s977_s30 = smov 32   ;;  %vm460_vm1 = vcmask 64512  }
  0x11   :  { %v74_v4 = vld [vmem:[#allocation5 + $0x50] sm:$0xff]  ;;  %149 = vmatpush.msra.mxu2 %v81_v2  ;;  %172 = vmatpush.msra.mxu3 %v82_v3  ;;  %v76_v6 = vld [vmem:[#allocation5 + $0x60] sm:$0xff]  ;;  %v77_v7 = vld [vmem:[#allocation5 + $0x68] sm:$0xff]  ;;  %s978_s4 = smov [#allocation8]   ;;  %s759_s8 = sshll.u32 %s1118_s3, 4  ;;  %s760_s8 = int_to_ptr.hbm [resolvable:$true] %s759_s8 }
  0x12   :  { %v69_v8 = vld [vmem:[#allocation5 + $0x28] sm:$0xff]  ;;  %104 = vmatpush.msra.mxu0 %v74_v4  ;;  %127 = vmatpush.msra.mxu1 %v75_v5  ;;  %v70_v9 = vld [vmem:[#allocation5 + $0x30] sm:$0xff]  ;;  %v71_v10 = vld [vmem:[#allocation5 + $0x38] sm:$0xff]  ;;  %s757_s5 = sshll.u32 %s978_s4, 4  ;;  %s758_s5 = int_to_ptr.vmem [resolvable:$true] %s757_s5 }
  0x13   :  { %v72_v11 = vld [vmem:[#allocation5 + $0x40] sm:$0xff]  ;;  %150 = vmatpush.msra.mxu2 %v76_v6  ;;  %173 = vmatpush.msra.mxu3 %v77_v7  ;;  %v65_v13 = vld [vmem:[#allocation5 + $0x8] sm:$0xff]  ;;  %v66_v14 = vld [vmem:[#allocation5 + $0x10] sm:$0xff] }
  0x14   :  { %v64_v12 = vld [vmem:[#allocation5] sm:$0xff]  ;;  %105 = vmatpush.msra.mxu0 %v69_v8  ;;  %128 = vmatpush.msra.mxu1 %v70_v9  ;;  %v67_v15 = vld [vmem:[#allocation5 + $0x18] sm:$0xff]  ;;  %v1014_v16 = vld [vmem:[#allocation2] sm:$0xff] }
  0x15   :  { %151 = vmatpush.msra.mxu2 %v71_v10  ;;  %174 = vmatpush.msra.mxu3 %v72_v11  ;;  %v63_v17 = vld [vmem:[#allocation2 + $0x8] sm:$0xff]  ;;  %v206_v18 = vld [vmem:[#allocation7] sm:$0xff]  ;;  %v207_v19 = vld [vmem:[#allocation7 + $0x8] sm:$0xff] }
  0x16   :  { %106 = vmatpush.msra.mxu0 %v64_v12  ;;  %129 = vmatpush.msra.mxu1 %v65_v13  ;;  %v83_v40 = vld [vmem:[#allocation5 + $0x98] sm:$0xff]  ;;  %v78_v41 = vld [vmem:[#allocation5 + $0x70] sm:$0xff]  ;;  %v73_v42 = vld [vmem:[#allocation5 + $0x48] sm:$0xff] }
  0x17   :  { %152 = vmatpush.msra.mxu2 %v66_v14  ;;  %175 = vmatpush.msra.mxu3 %v67_v15  ;;  %v68_v43 = vld [vmem:[#allocation5 + $0x20] sm:$0xff] }
  0x18   :  { %773 = vmatmul.msk.f32.vlgmr.msra.gmra.mxu0 %vm84_vm0, %v1014_v16  ;;  %775 = vmatmul.msk.f32.vlgmr.msra.gmra.mxu1 %vm84_vm0, %v1014_v16 }
  0x19   :  { %777 = vmatmul.msk.f32.vlgmr.msra.gmra.mxu2 %vm84_vm0, %v1014_v16  ;;  %779 = vmatmul.msk.f32.vlgmr.msra.gmra.mxu3 %vm84_vm0, %v1014_v16 }
  0x1a   :  { %195 = vmatpush.msrb.mxu0 %v83_v40 }
  0x1c   :  { %196 = vmatpush.msrb.mxu0 %v78_v41 }
  0x1e   :  { %197 = vmatpush.msrb.mxu0 %v73_v42 }
  0x20   :  { %774 = vmatmul.msk.f32.gmra.mxu0 %vm84_vm0, %v63_v17  ;;  %776 = vmatmul.msk.f32.gmra.mxu1 %vm84_vm0, %v63_v17 }
  0x21   :  { %778 = vmatmul.msk.f32.gmra.mxu2 %vm84_vm0, %v63_v17  ;;  %780 = vmatmul.msk.f32.gmra.mxu3 %vm84_vm0, %v63_v17 }
  0x22   :  { %198 = vmatpush.msrb.mxu0 %v68_v43 }
  0x28   :  { %781 = vmatmul.msk.f32.vlgmr.msrb.gmra.mxu0 %vm84_vm0, %v1014_v16 }
  0x30   :  { %782 = vmatmul.msk.f32.gmra.mxu0 %vm84_vm0, %v63_v17 }
  0x95   :  { %v108_v20 = vpop.f32.mrf.mxu0  ;;  %v131_v21 = vpop.f32.mrf.mxu1 }
  0x96   :  { %v208_v22 = vmul.f32 %v206_v18, %v108_v20  ;;  %v210_v23 = vmul.f32 %v207_v19, %v131_v21 }
  0x98   :  { %v212_v24 = vadd.f32 %v210_v23, %v208_v22 }
  0x9a   :  { %226 = vrot.lane.b32.xlu2 %v212_v24, %s975_s2 }
  0x9c   :  { %v154_v25 = vpop.f32.mrf.mxu2  ;;  %v177_v26 = vpop.f32.mrf.mxu3 }
  0x9d   :  { %v214_v27 = vmul.f32 %v206_v18, %v154_v25  ;;  %v216_v28 = vmul.f32 %v207_v19, %v177_v26  ;;  %v111_v29 = vpop.f32.mrf.mxu0  ;;  %v134_v30 = vpop.f32.mrf.mxu1 }
  0x9e   :  { %v209_v31 = vmul.f32 %v206_v18, %v111_v29  ;;  %v211_v32 = vmul.f32 %v207_v19, %v134_v30 }
  0x9f   :  { %v218_v33 = vadd.f32 %v216_v28, %v214_v27 }
  0xa0   :  { %v213_v34 = vadd.f32 %v211_v32, %v209_v31 }
  0xa1   :  { %240 = vrot.lane.b32.xlu1 %v218_v33, %s975_s2  ;;  %236 = vrot.lane.b32.xlu0 %v218_v33, %s976_s29 }
  0xa2   :  { %783 = vmatpush.xpose.msk.msrb.mxu1 %vm84_vm0, %v218_v33  ;;  %228 = vrot.lane.b32.xlu2 %v213_v34, %s975_s2 }
  0xa4   :  { %v157_v35 = vpop.f32.mrf.mxu2  ;;  %v180_v36 = vpop.f32.mrf.mxu3 }
  0xa5   :  { %v215_v37 = vmul.f32 %v206_v18, %v157_v35  ;;  %v217_v38 = vmul.f32 %v207_v19, %v180_v36  ;;  %784 = vmatmul.msk.f32.vlgmr.msrb.gmra.mxu1 %vm84_vm0, %v212_v24  ;;  %v200_v60 = vpop.f32.mrf.mxu0 }
  0xa7   :  { %v219_v39 = vadd.f32 %v217_v38, %v215_v37 }
  0xa9   :  { %242 = vrot.lane.b32.xlu1 %v219_v39, %s975_s2  ;;  %785 = vmatpush.xpose.msk.msrb.mxu2 %vm84_vm0, %v219_v39 }
  0xaa   :  { %222 = vrot.lane.b32.xlu0 %v212_v24, %s976_s29  ;;  %244 = vrot.lane.b32.xlu2 %v218_v33, %s977_s30 }
  0xac   :  { %786 = vmatmul.msk.f32.vlgmr.msrb.gmra.mxu2 %vm84_vm0, %v213_v34 }
  0xad   :  { %v203_v61 = vpop.f32.mrf.mxu0 }
  0xae   :  { %v1061_v62 = vpack.i.bf16 %v203_v61, %v200_v60 }
  0xb1   :  { %224 = vrot.lane.b32.xlu1 %v213_v34, %s976_s29 }
  0xb2   :  { %238 = vrot.lane.b32.xlu0 %v219_v39, %s976_s29  ;;  %232 = vrot.lane.b32.xlu2 %v213_v34, %s977_s30 }
  0xb9   :  { %230 = vrot.lane.b32.xlu1 %v212_v24, %s977_s30 }
  0xba   :  { %246 = vrot.lane.b32.xlu0 %v219_v39, %s977_s30 }
  0xf4   :  { %v227_v44 = vpop.permute.xlu2 %226 }
  0xfc   :  { %v229_v45 = vpop.permute.xlu2 %228 }
 0x104   :  { %v245_v46 = vpop.permute.xlu2 %244 }
 0x105   :  { %795 = vmatpush.xpose.msk.msra.mxu0 %vm84_vm0, %v245_v46 }
 0x10c   :  { %v233_v57 = vpop.permute.xlu2 %232 }
 0x113   :  { %v241_v47 = vpop.permute.xlu1 %240  ;;  %v237_v48 = vpop.permute.xlu0 %236 }
 0x114   :  { %787 = vmatpush.xpose.msk.msrb.mxu3 %vm84_vm0, %v237_v48  ;;  %791 = vmatpush.xpose.msk.msra.mxu2 %vm84_vm0, %v241_v47 }
 0x117   :  { %792 = vmatmul.msk.f32.vlgmr.msra.gmra.mxu2 %vm84_vm0, %v227_v44 }
 0x118   :  { %567 = vmatpush.msrb.mxu2 %v200_v60 }
 0x11b   :  { %v243_v49 = vpop.permute.xlu1 %242 }
 0x11c   :  { %v223_v50 = vpop.permute.xlu0 %222  ;;  %793 = vmatpush.xpose.msk.msra.mxu3 %vm84_vm0, %v243_v49 }
 0x11d   :  { %788 = vmatmul.msk.f32.vlgmr.msrb.gmra.mxu3 %vm84_vm0, %v223_v50 }
 0x120   :  { %590 = vmatpush.msrb.mxu3 %v203_v61 }
 0x122   :  { %v289_v51 = vpop.f32.mrf.mxu1 }
 0x123   :  { %v461_v52 = vsel %vm460_vm1, %v289_v51, -inf  ;;  %v225_v53 = vpop.permute.xlu1 %224 }
 0x124   :  { %v239_v54 = vpop.permute.xlu0 %238  ;;  %462 = vmax.xlane.f32.xlu0 %v461_v52 }
 0x125   :  { %789 = vmatpush.xpose.msk.msra.mxu1 %vm84_vm0, %v239_v54  ;;  %794 = vmatmul.msk.f32.vlgmr.msra.gmra.mxu3 %vm84_vm0, %v229_v45 }
 0x128   :  { %790 = vmatmul.msk.f32.vlgmr.msra.gmra.mxu1 %vm84_vm0, %v225_v53 }
 0x12b   :  { %v231_v55 = vpop.permute.xlu1 %230 }
 0x12c   :  { %v247_v56 = vpop.permute.xlu0 %246  ;;  %796 = vmatmul.msk.f32.vlgmr.msra.gmra.mxu0 %vm84_vm0, %v231_v55 }
 0x12d   :  { %797 = vmatpush.xpose.msk.msrb.mxu1 %vm84_vm0, %v247_v56 }
 0x12f   :  { %v313_v58 = vpop.f32.mrf.mxu2 }
 0x130   :  { %798 = vmatmul.msk.f32.vlgmr.msrb.gmra.mxu1 %vm84_vm0, %v233_v57  ;;  %v464_v59 = vsel %vm460_vm1, %v313_v58, -inf }
 0x131   :  { %465 = vmax.xlane.f32.xlu1 %v464_v59 }
 0x197   :  { %v463_v1 = vpop.xlane.xlu0 %462 }
 0x198   :  { %v485_v2 = vsub.f32 %v289_v51, %v463_v1 }
 0x19a   :  { %v385_v63 = vpop.f32.mrf.mxu2  ;;  %v493_v5 = vmul.f32 1.442695, %v485_v2 }
 0x19b   :  { %v473_v0 = vsel %vm460_vm1, %v385_v63, -inf }
 0x19c   :  { %474 = vmax.xlane.f32.xlu0 %v473_v0  ;;  %834 = vpow2.f32 %v493_v5 }
 0x1a0   :  { %v337_v3 = vpop.f32.mrf.mxu3 }
 0x1a1   :  { %v467_v4 = vsel %vm460_vm1, %v337_v3, -inf }
 0x1a2   :  { %468 = vmax.xlane.f32.xlu2 %v467_v4  ;;  %v835_v14 = vpop.eup %834 }
 0x1a3   :  { %v509_v17 = vsel %vm460_vm1, %v835_v14, 0.0 }
 0x1a4   :  { %v466_v7 = vpop.xlane.xlu1 %465 }
 0x1a5   :  { %v361_v6 = vpop.f32.mrf.mxu1  ;;  %v486_v9 = vsub.f32 %v313_v58, %v466_v7 }
 0x1a6   :  { %v470_v8 = vsel %vm460_vm1, %v361_v6, -inf }
 0x1a7   :  { %v495_v12 = vmul.f32 1.442695, %v486_v9 }
 0x1a8   :  { %v409_v10 = vpop.f32.mrf.mxu3 }
 0x1a9   :  { %v476_v11 = vsel %vm460_vm1, %v409_v10, -inf  ;;  %v433_v15 = vpop.f32.mrf.mxu0  ;;  %836 = vpow2.f32 %v495_v12 }
 0x1aa   :  { %471 = vmax.xlane.f32.xlu2 %v470_v8  ;;  %477 = vmax.xlane.f32.xlu1 %v476_v11  ;;  %v479_v18 = vsel %vm460_vm1, %v433_v15, -inf }
 0x1ad   :  { %v457_v13 = vpop.f32.mrf.mxu1 }
 0x1ae   :  { %v482_v16 = vsel %vm460_vm1, %v457_v13, -inf }
 0x1af   :  { %483 = vmax.xlane.f32.xlu0 %v482_v16  ;;  %v837_v19 = vpop.eup %836 }
 0x1b0   :  { %v512_v20 = vsel %vm460_vm1, %v837_v19, 0.0 }
 0x1b2   :  { %510 = vadd.xlane.f32.xlu1 %v509_v17  ;;  %480 = vmax.xlane.f32.xlu2 %v479_v18 }
 0x1ba   :  { %513 = vadd.xlane.f32.xlu2 %v512_v20 }
 0x20f   :  { %v475_v21 = vpop.xlane.xlu0 %474 }
 0x210   :  { %v489_v22 = vsub.f32 %v385_v63, %v475_v21 }
 0x212   :  { %v501_v23 = vmul.f32 1.442695, %v489_v22 }
 0x214   :  { %838 = vpow2.f32 %v501_v23 }
 0x215   :  { %v469_v24 = vpop.xlane.xlu2 %468 }
 0x216   :  { %v487_v25 = vsub.f32 %v337_v3, %v469_v24 }
 0x218   :  { %v497_v26 = vmul.f32 1.442695, %v487_v25 }
 0x21a   :  { %v1071_v27 = vpop.eup %838  ;;  %840 = vpow2.f32 %v497_v26 }
 0x21b   :  { %v521_v28 = vsel %vm460_vm1, %v1071_v27, 0.0 }
 0x21c   :  { %522 = vadd.xlane.f32.xlu2 %v521_v28 }
 0x21d   :  { %v472_v29 = vpop.xlane.xlu2 %471  ;;  %v478_v30 = vpop.xlane.xlu1 %477 }
 0x21e   :  { %v490_v31 = vsub.f32 %v409_v10, %v478_v30  ;;  %v488_v41 = vsub.f32 %v361_v6, %v472_v29 }
 0x220   :  { %v841_v32 = vpop.eup %840  ;;  %v503_v33 = vmul.f32 1.442695, %v490_v31  ;;  %v499_v46 = vmul.f32 1.442695, %v488_v41 }
 0x221   :  { %v515_v34 = vsel %vm460_vm1, %v841_v32, 0.0 }
 0x222   :  { %516 = vadd.xlane.f32.xlu0 %v515_v34  ;;  %v484_v35 = vpop.xlane.xlu0 %483  ;;  %842 = vpow2.f32 %v503_v33 }
 0x223   :  { %v492_v36 = vsub.f32 %v457_v13, %v484_v35 }
 0x225   :  { %v507_v37 = vmul.f32 1.442695, %v492_v36  ;;  %v511_v38 = vpop.xlane.xlu1 %510  ;;  %v481_v39 = vpop.xlane.xlu2 %480 }
 0x226   :  { %844 = vrcp.f32 %v511_v38  ;;  %v491_v40 = vsub.f32 %v433_v15, %v481_v39 }
 0x227   :  { %846 = vpow2.f32 %v507_v37  ;;  %v833_v37 = vld [vmem:[#allocation7 + $0x10] ss:$0 sm:$0xff] }
 0x228   :  { %v505_v42 = vmul.f32 1.442695, %v491_v40  ;;  %v1076_v43 = vpop.eup %842 }
 0x229   :  { %v524_v44 = vsel %vm460_vm1, %v1076_v43, 0.0 }
 0x22a   :  { %848 = vpow2.f32 %v505_v42  ;;  %525 = vadd.xlane.f32.xlu0 %v524_v44 }
 0x22c   :  { %v845_v45 = vpop.eup %844 }
 0x22d   :  { %v847_v47 = vpop.eup %846  ;;  %v541_v48 = vmul.f32 %v845_v45, %v835_v14  ;;  %v514_v49 = vpop.xlane.xlu2 %513 }
 0x22e   :  { %850 = vrcp.f32 %v514_v49  ;;  %v530_v50 = vsel %vm460_vm1, %v847_v47, 0.0 }
 0x22f   :  { %799 = vmatmul.msk.f32.vlgmr.msrb.gmra.mxu2 %vm460_vm1, %v541_v48  ;;  %531 = vadd.xlane.f32.xlu2 %v530_v50  ;;  %852 = vpow2.f32 %v499_v46 }
 0x230   :  { %v849_v51 = vpop.eup %848 }
 0x231   :  { %v527_v52 = vsel %vm460_vm1, %v849_v51, 0.0 }
 0x232   :  { %528 = vadd.xlane.f32.xlu1 %v527_v52 }
 0x234   :  { %v851_v53 = vpop.eup %850 }
 0x235   :  { %v542_v54 = vmul.f32 %v851_v53, %v837_v19  ;;  %v853_v55 = vpop.eup %852 }
 0x236   :  { %v518_v56 = vsel %vm460_vm1, %v853_v55, 0.0 }
 0x237   :  { %800 = vmatmul.msk.f32.vlgmr.msrb.gmra.mxu3 %vm460_vm1, %v542_v54 }
 0x23a   :  { %519 = vadd.xlane.f32.xlu1 %v518_v56 }
 0x23e   :  { %819 = vrot.lane.b32.xlu0 %v1061_v62, %s976_s29 }
 0x247   :  { %829 = vrot.lane.b32.xlu2 %v1061_v62, %s977_s30 }
 0x253   :  { %824 = vrot.lane.b32.xlu1 %v1061_v62, %s975_s2 }
 0x28f   :  { %v523_v57 = vpop.xlane.xlu2 %522 }
 0x295   :  { %v517_v58 = vpop.xlane.xlu0 %516 }
 0x296   :  { %854 = vrcp.f32 %v517_v58 }
 0x29c   :  { %v855_v0 = vpop.eup %854 }
 0x29d   :  { %v526_v61 = vpop.xlane.xlu0 %525  ;;  %v543_v5 = vmul.f32 %v855_v0, %v841_v32 }
 0x2a2   :  { %v532_v60 = vpop.xlane.xlu2 %531 }
 0x2a5   :  { %v529_v59 = vpop.xlane.xlu1 %528 }
 0x2aa   :  { %v830_v1 = vpop.permute.xlu2 %829 }
 0x2ab   :  { %v832_v6 = vunpack.i.h.bf16 %v830_v1  ;;  %v831_v8 = vunpack.i.l.bf16 %v830_v1 }
 0x2ad   :  { %v520_v63 = vpop.xlane.xlu1 %519 }
 0x2ae   :  { %856 = vrcp.f32 %v520_v63 }
 0x2af   :  { %858 = vrcp.f32 %v529_v59 }
 0x2b0   :  { %v820_v2 = vpop.permute.xlu0 %819  ;;  %860 = vrcp.f32 %v532_v60 }
 0x2b1   :  { %v822_v3 = vunpack.i.h.bf16 %v820_v2  ;;  %v821_v4 = vunpack.i.l.bf16 %v820_v2  ;;  %862 = vrcp.f32 %v523_v57 }
 0x2b2   :  { %864 = vrcp.f32 %v526_v61  ;;  %v569_v22 = vpop.f32.mrf.mxu2 }
 0x2b3   :  { %613 = vmatpush.msrb.mxu0 %v821_v4  ;;  %636 = vmatpush.msra.mxu1 %v822_v3  ;;  %v734_v26 = vsel %vm84_vm0, %v569_v22, 0.0 }
 0x2b4   :  { %v857_v7 = vpop.eup %856  ;;  %801 = vmatmul.msk.f32.vlgmr.msrb.gmra.mxu0 %vm460_vm1, %v543_v5 }
 0x2b5   :  { %v544_v62 = vmul.f32 %v857_v7, %v853_v55  ;;  %728 = vmatpush.msrb.mxu1 %v832_v6  ;;  %705 = vmatpush.msra.mxu0 %v831_v8  ;;  %v859_v9 = vpop.eup %858 }
 0x2b6   :  { %v861_v10 = vpop.eup %860  ;;  %v547_v11 = vmul.f32 %v859_v9, %v849_v51 }
 0x2b7   :  { %802 = vmatmul.msk.f32.vlgmr.msra.gmra.mxu1 %vm460_vm1, %v544_v62  ;;  %v548_v12 = vmul.f32 %v861_v10, %v847_v47  ;;  %v863_v13 = vpop.eup %862 }
 0x2b8   :  { %v865_v14 = vpop.eup %864  ;;  %v545_v18 = vmul.f32 %v863_v13, %v1071_v27 }
 0x2b9   :  { %v546_v19 = vmul.f32 %v865_v14, %v1076_v43 }
 0x2ba   :  { %v592_v23 = vpop.f32.mrf.mxu3 }
 0x2bb   :  { %v741_v27 = vsel %vm84_vm0, %v592_v23, 0.0 }
 0x2bc   :  { %805 = vmatmul.msk.f32.vlgmr.msra.gmra.mxu0 %vm460_vm1, %v547_v11 }
 0x2bf   :  { %806 = vmatmul.msk.f32.vlgmr.msrb.gmra.mxu1 %vm460_vm1, %v548_v12 }
 0x2c5   :  { %v825_v15 = vpop.permute.xlu1 %824 }
 0x2c6   :  { %v827_v16 = vunpack.i.h.bf16 %v825_v15  ;;  %v826_v17 = vunpack.i.l.bf16 %v825_v15 }
 0x2c8   :  { %659 = vmatpush.msra.mxu2 %v826_v17  ;;  %682 = vmatpush.msra.mxu3 %v827_v16 }
 0x2c9   :  { %803 = vmatmul.msk.f32.vlgmr.msra.gmra.mxu2 %vm460_vm1, %v545_v18  ;;  %804 = vmatmul.msk.f32.vlgmr.msra.gmra.mxu3 %vm460_vm1, %v546_v19 }
 0x331   :  { %v615_v20 = vpop.f32.mrf.mxu0 }
 0x332   :  { %v735_v24 = vsel %vm84_vm0, %v615_v20, 0.0 }
 0x333   :  { %v736_v30 = vadd.f32 %v735_v24, %v734_v26 }
 0x334   :  { %v638_v21 = vpop.f32.mrf.mxu1 }
 0x335   :  { %v742_v25 = vsel %vm84_vm0, %v638_v21, 0.0 }
 0x336   :  { %v743_v31 = vadd.f32 %v742_v25, %v741_v27 }
 0x339   :  { %v707_v28 = vpop.f32.mrf.mxu0 }
 0x33a   :  { %v739_v39 = vsel %vm84_vm0, %v707_v28, 0.0 }
 0x33c   :  { %v730_v29 = vpop.f32.mrf.mxu1 }
 0x33d   :  { %v746_v40 = vsel %vm84_vm0, %v730_v29, 0.0 }
 0x34c   :  { %v661_v32 = vpop.f32.mrf.mxu2  ;;  %v684_v33 = vpop.f32.mrf.mxu3 }
 0x34d   :  { %v737_v34 = vsel %vm84_vm0, %v661_v32, 0.0  ;;  %v744_v35 = vsel %vm84_vm0, %v684_v33, 0.0 }
 0x34e   :  { %v738_v36 = vadd.f32 %v737_v34, %v736_v30  ;;  %v745_v38 = vadd.f32 %v744_v35, %v743_v31 }
 0x350   :  { %v740_v41 = vadd.f32 %v739_v39, %v738_v36  ;;  %v747_v42 = vadd.f32 %v746_v40, %v745_v38 }
 0x352   :  { %v749_v43 = vadd.f32 %v833_v37, %v740_v41  ;;  %v750_v44 = vadd.f32 %v833_v37, %v747_v42 }
 0x354   :  { %751 = vst.msk [vmem:[#allocation8] sm:$0xff] %vm84_vm0, %v749_v43 }
 0x355   :  { %752 = vst.msk [vmem:[#allocation8 + $0x8] sm:$0xff] %vm84_vm0, %v750_v44 }
 0x356   :  { %765 = dma.vmem_to_hbm [thread:$0]  %s758_s5, 256, %s760_s8, [#allocation4], %s972_s24, %s972_s24, %s973_s25  }
 0x357   :  { %966 = dma.done.wait [#allocation4], 256  }
 0x358   :  { %967 = vsyncadd [#allocation4], 4294967040 }
 0x359   :  { %770 = vsyncpa [#allocation3], 1 }
 0x35a   :  { %771 = vsyncpa [#allocation6], 1 }
 0x35b   :  { %772 = vsyncpa [#allocation4], 1 }

</bundles_post_ra>
